<compile_context>
chip_gen: v7x
topology: tpu7x:2x2x1
jax: 0.10.0
libtpu: 0.0.40
codegen_flags: <defaults>
</compile_context>

<pallas_src>
import jax
import jax.numpy as jnp
from jax.experimental import pallas as pl
from jax.experimental.pallas import tpu as pltpu


# -----------------------------------------------------------------------------
# Kernels (one per GCN hop; all row-tiled over nodes, "parallel" grid axis)
# -----------------------------------------------------------------------------
def _proj_kernel(xb_ref, w1_ref, xw_ref):
    # Layer-1 feature projection, pos|neg lane-concatenated via block-diag W1:
    #   xw = [x | x_cor] @ blkdiag(W1, W1)          -> (tile, 2H)
    xw_ref[...] = jnp.dot(xb_ref[...], w1_ref[...],
                          preferred_element_type=jnp.float32).astype(xw_ref.dtype)


def _layer1_kernel(adj_ref, xw_ref, whead_ref, hw_ref):
    # h  = relu(A_tile @ xw)                        -> (tile, 2H)
    # hw = h @ [[Wmu,Wlv,0,0],[0,0,Wmu,Wlv]]        -> (tile, 4H)  (lane-dense)
    h = jnp.maximum(jnp.dot(adj_ref[...], xw_ref[...],
                            preferred_element_type=jnp.float32), 0.0)
    hw_ref[...] = jnp.dot(h.astype(jnp.bfloat16), whead_ref[...],
                          preferred_element_type=jnp.float32).astype(hw_ref.dtype)


def _layer2_kernel(adj_ref, hw_ref, noise_ref, wdec_ref, slab_ref, xrec_ref):
    # mulv = A_tile @ hw = [mu_pos | lv_pos | mu_neg | lv_neg]  (tile, 4H)
    # 128+ output lanes on the dominant N^2 matmul.
    H = noise_ref.shape[1] // 2
    mulv = jnp.dot(adj_ref[...], hw_ref[...], preferred_element_type=jnp.float32)
    noise = noise_ref[...]
    mu_p, lv_p = mulv[:, :H], mulv[:, H:2 * H]
    mu_n, lv_n = mulv[:, 2 * H:3 * H], mulv[:, 3 * H:]

    # Reparameterization (f32), independent eps for pos / neg passes.
    pos_z = mu_p + jnp.exp(0.5 * lv_p) * noise[:, :H]
    neg_z = mu_n + jnp.exp(0.5 * lv_n) * noise[:, H:]

    # Lane-dense (tile, 4H) output slab: [pos_z | neg_z | mu_pos | logvar_pos].
    slab_ref[...] = jnp.concatenate([pos_z, neg_z, mu_p, lv_p], axis=1)

    # Decoder: linear reconstruction, lane dim padded to a multiple of 128.
    xrec_ref[...] = jnp.dot(pos_z.astype(jnp.bfloat16), wdec_ref[...],
                            preferred_element_type=jnp.float32)


# -----------------------------------------------------------------------------
# Host-side helpers
# -----------------------------------------------------------------------------
def _round_up(a, b):
    return (a + b - 1) // b * b


def _device_vmem_bytes():
    try:
        return int(pltpu.get_tpu_info().vmem_capacity_bytes)
    except Exception:
        return 64 * 1024 * 1024   # conservative (v7x per-TC VMEM)


def _vmem_limit(block_bytes, resident_bytes):
    # double-buffered streamed blocks + resident (grid-invariant) buffers,
    # plus margin; clamped to the physical VMEM of this chip generation.
    need = int((2 * block_bytes + resident_bytes) * 1.25) + (2 << 20)
    return int(max(16 << 20, min(need, _device_vmem_bytes() - (4 << 20))))


def _corruption_and_noise(key, n, hidden):
    """DGI node permutation + reparameterization noise ([eps_pos | eps_neg])."""
    perm = jax.random.permutation(jax.random.fold_in(key, 1), n)
    noise = jax.random.normal(jax.random.fold_in(key, 2), (n, 2 * hidden), jnp.float32)
    return perm, noise


def init_params(key, in_feats, hidden):
    k1, k2, k3, k4, k5 = jax.random.split(key, 5)

    def glorot(k, shape):
        bound = (6.0 / (shape[0] + shape[1])) ** 0.5
        return jax.random.uniform(k, shape, jnp.float32, -bound, bound)

    # self.weight of stDGCC_Model: uniform(hidden_channels, weight).
    b = 1.0 / (hidden ** 0.5)
    return {
        "w1": glorot(k1, (in_feats, hidden)),
        "wmu": glorot(k2, (hidden, hidden)),
        "wlv": glorot(k3, (hidden, hidden)),
        "wdec": glorot(k4, (hidden, in_feats)),
        # Discriminator weight: used only by discriminate()/CL_Loss, not forward().
        "disc_weight": jax.random.uniform(k5, (hidden, hidden), jnp.float32, -b, b),
    }


# -----------------------------------------------------------------------------
# Forward pass
# -----------------------------------------------------------------------------
def stdgcc_forward(x, adj, params, key, *, row_tile=128):
    N, F = x.shape
    H = params["w1"].shape[1]
    bf16, f32 = jnp.bfloat16, jnp.float32
    assert row_tile % 8 == 0

    # ---- corruption + noise (wrapper-side; O(N*F) gather, no N^2 work) ------
    perm, noise = _corruption_and_noise(key, N, H)
    x_cor = jnp.take(x, perm, axis=0)

    # ---- row tiling / padding ------------------------------------------------
    tm = min(row_tile, _round_up(N, 8))
    Np = _round_up(N, tm)
    ng = Np // tm
    Fp = _round_up(F, 128)                     # lane-dense reconstruction output
    pad_n = Np - N

    x_both = jnp.concatenate([x, x_cor], axis=1)                       # (N, 2F)
    x_both = jnp.pad(x_both, ((0, pad_n), (0, 0))).astype(bf16)        # (Np, 2F)
    adj_p = jnp.pad(adj, ((0, pad_n), (0, pad_n))).astype(bf16)        # (Np, Np)
    noise_p = jnp.pad(noise, ((0, pad_n), (0, 0)))                     # (Np, 2H), zero pad -> padded z rows are 0

    # ---- block-diagonal fused weights (pos|neg stay lane-concatenated) ------
    w1, wmu, wlv, wdec = (params[k] for k in ("w1", "wmu", "wlv", "wdec"))
    zF = jnp.zeros((F, H), f32)
    zH = jnp.zeros((H, H), f32)
    w1big = jnp.concatenate(
        [jnp.concatenate([w1, zF], axis=1),
         jnp.concatenate([zF, w1], axis=1)], axis=0).astype(bf16)          # (2F, 2H)
    whead = jnp.concatenate(
        [jnp.concatenate([wmu, wlv, zH, zH], axis=1),
         jnp.concatenate([zH, zH, wmu, wlv], axis=1)], axis=0).astype(bf16)  # (2H, 4H)
    wdec_p = jnp.pad(wdec, ((0, 0), (0, Fp - F))).astype(bf16)              # (H, Fp)

    # ---- call 0: feature projection  xw = [x | x_cor] @ blkdiag(W1, W1) -----
    xw = pl.pallas_call(
        _proj_kernel,
        grid=(ng,),
        in_specs=[pl.BlockSpec((tm, 2 * F), lambda i: (i, 0)),
                  pl.BlockSpec((2 * F, 2 * H), lambda i: (0, 0))],
        out_specs=pl.BlockSpec((tm, 2 * H), lambda i: (i, 0)),
        out_shape=jax.ShapeDtypeStruct((Np, 2 * H), bf16),
        compiler_params=pltpu.CompilerParams(
            dimension_semantics=("parallel",),
            vmem_limit_bytes=_vmem_limit(
                tm * 2 * F * 2 + tm * 2 * H * 2, 2 * F * 2 * H * 2)),
    )(x_both, w1big)

    # ---- call 1: h = relu(A @ xw); hw = h @ Whead  (row-tiled over A) --------
    hw = pl.pallas_call(
        _layer1_kernel,
        grid=(ng,),
        in_specs=[pl.BlockSpec((tm, Np), lambda i: (i, 0)),
                  pl.BlockSpec((Np, 2 * H), lambda i: (0, 0)),
                  pl.BlockSpec((2 * H, 4 * H), lambda i: (0, 0))],
        out_specs=pl.BlockSpec((tm, 4 * H), lambda i: (i, 0)),
        out_shape=jax.ShapeDtypeStruct((Np, 4 * H), bf16),
        compiler_params=pltpu.CompilerParams(
            dimension_semantics=("parallel",),
            vmem_limit_bytes=_vmem_limit(
                tm * Np * 2 + tm * 4 * H * 2,
                Np * 2 * H * 2 + 2 * H * 4 * H * 2)),
    )(adj_p, xw, whead)

    # ---- call 2: mulv = A @ hw; reparam; slab; decoder (row-tiled over A) ----
    slab, xrec = pl.pallas_call(
        _layer2_kernel,
        grid=(ng,),
        in_specs=[pl.BlockSpec((tm, Np), lambda i: (i, 0)),
                  pl.BlockSpec((Np, 4 * H), lambda i: (0, 0)),
                  pl.BlockSpec((tm, 2 * H), lambda i: (i, 0)),
                  pl.BlockSpec((H, Fp), lambda i: (0, 0))],
        out_specs=(pl.BlockSpec((tm, 4 * H), lambda i: (i, 0)),
                   pl.BlockSpec((tm, Fp), lambda i: (i, 0))),
        out_shape=(jax.ShapeDtypeStruct((Np, 4 * H), f32),
                   jax.ShapeDtypeStruct((Np, Fp), f32)),
        compiler_params=pltpu.CompilerParams(
            dimension_semantics=("parallel",),
            vmem_limit_bytes=_vmem_limit(
                tm * Np * 2 + tm * 2 * H * 4 + tm * 4 * H * 4 + tm * Fp * 4,
                Np * 4 * H * 2 + H * Fp * 2)),
    )(adj_p, hw, noise_p, wdec_p)

    pos_z = slab[:N, :H]
    neg_z = slab[:N, H:2 * H]
    mu = slab[:N, 2 * H:3 * H]
    logvar = slab[:N, 3 * H:]
    # summary(pos_z): tiny (N, H)->(1, H) epilogue left to XLA, because a
    # cross-tile reduction inside the kernel would break the "parallel"
    # (megacore-sharded) row grid.
    s = jax.nn.sigmoid(jnp.mean(pos_z, axis=0, keepdims=True))
    x_rec = xrec[:N, :F]
    return pos_z, neg_z, s, mu, logvar, x_rec


# -----------------------------------------------------------------------------
# Pure-JAX reference (natural per-pass form, same bf16 cast points)
# -----------------------------------------------------------------------------
def stdgcc_reference(x, adj, params, key):
    N, F = x.shape
    H = params["w1"].shape[1]
    bf16, f32 = jnp.bfloat16, jnp.float32

    perm, noise = _corruption_and_noise(key, N, H)
    adj_bf = adj.astype(bf16)
    w1_bf = params["w1"].astype(bf16)
    wmu_bf = params["wmu"].astype(bf16)
    wlv_bf = params["wlv"].astype(bf16)
    wdec_bf = params["wdec"].astype(bf16)

    def dot(a, b):
        return jnp.dot(a, b, preferred_element_type=f32)

    def encode(feat, eps):
        fb = feat.astype(bf16)
        xw = dot(fb, w1_bf).astype(bf16)            # project-first GCNConv
        h = jnp.maximum(dot(adj_bf, xw), 0.0)
        hb = h.astype(bf16)
        hmu = dot(hb, wmu_bf).astype(bf16)
        hlv = dot(hb, wlv_bf).astype(bf16)
        mu = dot(adj_bf, hmu)
        lv = dot(adj_bf, hlv)
        z = mu + jnp.exp(0.5 * lv) * eps
        return z, mu, lv

    pos_z, mu, logvar = encode(x, noise[:, :H])
    neg_z, _, _ = encode(jnp.take(x, perm, axis=0), noise[:, H:])
    s = jax.nn.sigmoid(jnp.mean(pos_z, axis=0, keepdims=True))
    x_rec = dot(pos_z.astype(bf16), wdec_bf)
    return pos_z, neg_z, s, mu, logvar, x_rec


def _normalized_adjacency(key, n):
    # deterministic symmetric graph + self-loops, D^-1/2 (A + I) D^-1/2
    r = jax.random.uniform(key, (n, n), jnp.float32)
    a = (r + r.T) * 0.5 > 0.7
    a = a.astype(jnp.float32) + jnp.eye(n, dtype=jnp.float32)
    d = jnp.sum(a, axis=1)
    dinv = 1.0 / jnp.sqrt(d)
    return a * dinv[:, None] * dinv[None, :]


# -----------------------------------------------------------------------------
# Demo / self-check
# -----------------------------------------------------------------------------
if __name__ == "__main__":
    key = jax.random.PRNGKey(0)
    names = ("pos_z", "neg_z", "s", "mu", "logvar", "x_")

    # cfg 0: multi-tile row grid (2 tiles), F not a multiple of 128 (F padding).
    # cfg 1: N not a multiple of the row tile (row padding) + wider hidden dim.
    for cfg_id, (N, F, H) in enumerate([(256, 96, 32), (200, 48, 64)]):
        kx, ka, kp, kf = jax.random.split(jax.random.fold_in(key, cfg_id), 4)
        x = jax.random.normal(kx, (N, F), jnp.float32)
        adj = _normalized_adjacency(ka, N)
        params = init_params(kp, F, H)

        outs = jax.block_until_ready(stdgcc_forward(x, adj, params, kf))
        refs = jax.block_until_ready(stdgcc_reference(x, adj, params, kf))

        expected_shapes = ((N, H), (N, H), (1, H), (N, H), (N, H), (N, F))
        for name, o, r, shp in zip(names, outs, refs, expected_shapes):
            assert o.shape == shp, (name, o.shape, shp)
            assert bool(jnp.all(jnp.isfinite(o))), name
            assert bool(jnp.allclose(o, r, rtol=2e-2, atol=2e-2)), name

    print("KERNEL_OK")
</pallas_src>

<mosaic_0001>
module attributes {stable_mosaic.version = 11 : i64} {
  func.func @_proj_kernel(%arg0: i32, %arg1: memref<128x192xbf16, #tpu.memory_space<vmem>>, %arg2: memref<192x64xbf16, #tpu.memory_space<vmem>>, %arg3: memref<128x64xbf16, #tpu.memory_space<vmem>>) attributes {dimension_semantics = [#tpu.dimension_semantics<parallel>], iteration_bounds = array<i64: 2>, scalar_prefetch = 0 : i64, scratch_operands = 0 : i64, tpu.core_type = #tpu.core_type<tc>, window_params = [{transform_indices = @transform_0, window_bounds = array<i64: 128, 192>}, {pipeline_mode = #tpu.pipeline_mode<synchronous>, transform_indices = @transform_1, window_bounds = array<i64: 192, 64>}, {transform_indices = @transform_2, window_bounds = array<i64: 128, 64>}]} {
    %c0 = arith.constant 0 : index
    %c0_0 = arith.constant 0 : index
    %0 = vector.load %arg1[%c0, %c0_0] : memref<128x192xbf16, #tpu.memory_space<vmem>>, vector<128x192xbf16>
    %c0_1 = arith.constant 0 : index
    %c0_2 = arith.constant 0 : index
    %1 = vector.load %arg2[%c0_1, %c0_2] : memref<192x64xbf16, #tpu.memory_space<vmem>>, vector<192x64xbf16>
    %cst = arith.constant dense<0.000000e+00> : vector<128x64xf32>
    %2 = tpu.matmul %0, %1, %cst {dimension_numbers = #tpu.dot_dimension_numbers<[1], [0], [0], [1], [0, 0, 1, 1], [], []>} : vector<128x192xbf16>, vector<192x64xbf16>, vector<128x64xf32> -> vector<128x64xf32>
    %3 = arith.truncf %2 : vector<128x64xf32> to vector<128x64xbf16>
    %c0_3 = arith.constant 0 : index
    %c0_4 = arith.constant 0 : index
    %4 = vector.load %arg3[%c0_3, %c0_4] : memref<128x64xbf16, #tpu.memory_space<vmem>>, vector<128x64xbf16>
    tpu.vector_store %arg3[%c0_3, %c0_4], %3 {strides = array<i32>} : memref<128x64xbf16, #tpu.memory_space<vmem>>, vector<128x64xbf16>,
    return
  }
  func.func @transform_0(%arg0: i32) -> (i32, i32) {
    %c0_i32 = arith.constant 0 : i32
    %c0_i32_0 = arith.constant 0 : i32
    return %arg0, %c0_i32 : i32, i32
  }
  func.func @transform_1(%arg0: i32) -> (i32, i32) {
    %c0_i32 = arith.constant 0 : i32
    %c0_i32_0 = arith.constant 0 : i32
    %c0_i32_1 = arith.constant 0 : i32
    return %c0_i32, %c0_i32_0 : i32, i32
  }
  func.func @transform_2(%arg0: i32) -> (i32, i32) {
    %c0_i32 = arith.constant 0 : i32
    %c0_i32_0 = arith.constant 0 : i32
    return %arg0, %c0_i32 : i32, i32
  }
}

</mosaic_0001>

<bundles_post_ra>
// kernel: tpu_custom_call.1
= control target key start
LH: loop header
LB: loop body
LE: loop exit
PB: predicated region body
PF: predicated region fallthrough
CT: control target
= control target key end

     0   :  { %s768_s9 = smov 0   ;;  %s909_s0 = inlined_call_operand.vmem [shape: bf16[256,192], index: 0, kind: input, shape index: {}]   ;;  %s910_s1 = inlined_call_operand.vmem [shape: bf16[192,64], index: 1, kind: input, shape index: {}]   ;;  %s911_s2 = inlined_call_operand.vmem [shape: bf16[256,64], index: 2, kind: output, shape index: {}]  }
   0x1 LB: > { %s594_s10 = sadd.s32 4294967295, %s750_s9   ;;  %p598_p0 = scmp.ge.s32.totalorder %s750_s9, 1  ;;  %s750_s9 = sphi %s768_s9, %s12_s9  }
   0x2   : > { %p114_p1 = scmp.lt.s32.totalorder %s750_s9, 3 }
   0x4   : > { %p115_p2 = pnand %p598_p0, %p114_p1 }
   0x5   : > { %v708_v0 = vld [vmem:[%s910_s1] sm:$0xff] (!%p115_p2)   ;;  %v752_v1 = vmov (!%p115_p2), 0   ;;  %s599_s13 = sshll.u32 (!%p115_p2), %s594_s10, 4  ;;  %v709_v2 = vld [vmem:[%s910_s1 + $0x8] sm:$0xff] (!%p115_p2)   ;;  %v710_v3 = vld [vmem:[%s910_s1 + $0x10] sm:$0xff] (!%p115_p2)   ;;  %vm335_vm0 = vcmask (!%p115_p2), 523264  }
   0x6   : > { %118 = sbr.rel (%p115_p2) target bundleno = 295 (0x127), region = 28  ;;  %360 = vmatprep.subr.bf16.mxu0 (!%p115_p2), %v752_v1  ;;  %675 = vmatprep.subr.bf16.mxu1 (!%p115_p2), %v752_v1  ;;  %p138_p3 = scmp.lt.s32.totalorder (!%p115_p2), %s599_s13, 31  ;;  %v711_v4 = vld [vmem:[%s910_s1 + $0x18] sm:$0xff] (!%p115_p2)   ;;  %v712_v6 = vld [vmem:[%s910_s1 + $0x20] sm:$0xff] (!%p115_p2)   ;;  %v713_v8 = vld [vmem:[%s910_s1 + $0x28] sm:$0xff] (!%p115_p2)   ;;  %vm521_vm1 = vcmask (!%p115_p2), 519168  }
   0x7   : > { %361 = vmatpush1.bf16.msra.mxu0 (!%p115_p2), %v708_v0  ;;  %687 = vmatpush1.bf16.msra.mxu1 (!%p115_p2), %v708_v0  ;;  %v714_v9 = vld [vmem:[%s910_s1 + $0x30] sm:$0xff] (!%p115_p2)   ;;  %v715_v10 = vld [vmem:[%s910_s1 + $0x38] sm:$0xff] (!%p115_p2)   ;;  %v716_v11 = vld [vmem:[%s910_s1 + $0x40] sm:$0xff] (!%p115_p2)  }
   0x8   : > { %362 = vmatprep.subr.bf16.mxu0 (!%p115_p2), %v752_v1  ;;  %676 = vmatprep.subr.bf16.mxu1 (!%p115_p2), %v752_v1  ;;  %v717_v12 = vld [vmem:[%s910_s1 + $0x48] sm:$0xff] (!%p115_p2)   ;;  %v718_v13 = vld [vmem:[%s910_s1 + $0x50] sm:$0xff] (!%p115_p2)   ;;  %v719_v14 = vld [vmem:[%s910_s1 + $0x58] sm:$0xff] (!%p115_p2)  }
   0xb   : > { %363 = vmatpush1.bf16.msra.mxu0 (!%p115_p2), %v709_v2  ;;  %688 = vmatpush1.bf16.msra.mxu1 (!%p115_p2), %v709_v2 }
   0xc   : > { %364 = vmatprep.subr.bf16.mxu0 (!%p115_p2), %v752_v1  ;;  %677 = vmatprep.subr.bf16.mxu1 (!%p115_p2), %v752_v1 }
   0xd   : > { %s913_s13 = smov (!%p138_p3, %s599_s13), 31 }
   0xe   : > { %s658_s18 = sshll.u32 %s913_s13, 3  ;;  %s603_s14 = sshll.u32 %s913_s13, 2 }
   0xf   : > { %365 = vmatpush1.bf16.msra.mxu0 %v710_v3  ;;  %689 = vmatpush1.bf16.msra.mxu1 %v710_v3  ;;  %s800_s23 = scalar_lea.vmem %s909_s0, %s658_s18  ;;  %s872_s17 = scalar_lea.vmem %s911_s2, %s603_s14 }
  0x10   : > { %366 = vmatprep.subr.bf16.mxu0 %v752_v1  ;;  %678 = vmatprep.subr.bf16.mxu1 %v752_v1  ;;  %v722_v5 = vld [vmem:[%s800_s23 + $0x4] ss:$8 sps:$4 sm:$0xff]   ;;  %v720_v15 = vld [vmem:[%s800_s23] ss:$8 sps:$4 sm:$0xff]   ;;  %v726_v17 = vld [vmem:[%s800_s23 + $0x14] ss:$8 sps:$4 sm:$0xff]  }
  0x11   : > { %v725_v7 = vld [vmem:[%s800_s23 + $0x44] ss:$8 sps:$4 sm:$0xff]   ;;  %632 = vmatprep.mubr.msk.bf16.mxu0 %vm335_vm0, %v722_v5  ;;  %v723_v16 = vld [vmem:[%s800_s23 + $0x40] ss:$8 sps:$4 sm:$0xff]   ;;  %v728_v18 = vld [vmem:[%s800_s23 + $0x54] ss:$8 sps:$4 sm:$0xff]  }
  0x12   : > { %636 = vmatprep.mubr.msk.bf16.mxu1 %vm335_vm0, %v725_v7  ;;  %v730_v19 = vld [vmem:[%s800_s23 + $0x10] ss:$8 sps:$4 sm:$0xff]   ;;  %v732_v21 = vld [vmem:[%s800_s23 + $0x24] ss:$8 sps:$4 sm:$0xff]   ;;  %v736_v23 = vld [vmem:[%s800_s23 + $0x20] ss:$8 sps:$4 sm:$0xff]  }
  0x13   : > { %367 = vmatpush1.bf16.msra.mxu0 %v711_v4  ;;  %690 = vmatpush1.bf16.msra.mxu1 %v711_v4  ;;  %v731_v20 = vld [vmem:[%s800_s23 + $0x50] ss:$8 sps:$4 sm:$0xff]   ;;  %v734_v22 = vld [vmem:[%s800_s23 + $0x64] ss:$8 sps:$4 sm:$0xff]   ;;  %v737_v24 = vld [vmem:[%s800_s23 + $0x60] ss:$8 sps:$4 sm:$0xff]  }
  0x14   : > { %368 = vmatprep.subr.bf16.mxu0 %v752_v1  ;;  %679 = vmatprep.subr.bf16.mxu1 %v752_v1  ;;  %v738_v25 = vld [vmem:[%s800_s23 + $0x34] ss:$8 sps:$4 sm:$0xff]   ;;  %v742_v27 = vld [vmem:[%s800_s23 + $0x30] ss:$8 sps:$4 sm:$0xff]  }
  0x15   : > { %v740_v26 = vld [vmem:[%s800_s23 + $0x74] ss:$8 sps:$4 sm:$0xff]   ;;  %v743_v28 = vld [vmem:[%s800_s23 + $0x70] ss:$8 sps:$4 sm:$0xff]  }
  0x17   : > { %369 = vmatpush1.bf16.msra.mxu0 %v712_v6  ;;  %691 = vmatpush1.bf16.msra.mxu1 %v712_v6 }
  0x18   : > { %370 = vmatprep.subr.bf16.mxu0 %v752_v1  ;;  %680 = vmatprep.subr.bf16.mxu1 %v752_v1 }
  0x1b   : > { %371 = vmatpush1.bf16.msra.mxu0 %v713_v8  ;;  %692 = vmatpush1.bf16.msra.mxu1 %v713_v8 }
  0x1c   : > { %372 = vmatprep.subr.bf16.mxu0 %v752_v1  ;;  %681 = vmatprep.subr.bf16.mxu1 %v752_v1 }
  0x1f   : > { %373 = vmatpush1.bf16.msra.mxu0 %v714_v9  ;;  %693 = vmatpush1.bf16.msra.mxu1 %v714_v9 }
  0x20   : > { %374 = vmatprep.subr.bf16.mxu0 %v752_v1  ;;  %682 = vmatprep.subr.bf16.mxu1 %v752_v1 }
  0x23   : > { %375 = vmatpush1.bf16.msra.mxu0 %v715_v10  ;;  %694 = vmatpush1.bf16.msra.mxu1 %v715_v10 }
  0x24   : > { %376 = vmatprep.subr.bf16.mxu0 %v752_v1  ;;  %683 = vmatprep.subr.bf16.mxu1 %v752_v1 }
  0x27   : > { %377 = vmatpush1.bf16.msra.mxu0 %v716_v11  ;;  %695 = vmatpush1.bf16.msra.mxu1 %v716_v11 }
  0x28   : > { %378 = vmatprep.subr.bf16.mxu0 %v752_v1  ;;  %684 = vmatprep.subr.bf16.mxu1 %v752_v1 }
  0x2b   : > { %379 = vmatpush1.bf16.msra.mxu0 %v717_v12  ;;  %696 = vmatpush1.bf16.msra.mxu1 %v717_v12 }
  0x2c   : > { %380 = vmatprep.subr.bf16.mxu0 %v752_v1  ;;  %685 = vmatprep.subr.bf16.mxu1 %v752_v1 }
  0x2f   : > { %381 = vmatpush1.bf16.msra.mxu0 %v718_v13  ;;  %697 = vmatpush1.bf16.msra.mxu1 %v718_v13 }
  0x30   : > { %382 = vmatprep.subr.bf16.mxu0 %v752_v1  ;;  %686 = vmatprep.subr.bf16.mxu1 %v752_v1 }
  0x33   : > { %383 = vmatpush1.bf16.msra.mxu0 %v719_v14  ;;  %698 = vmatpush1.bf16.msra.mxu1 %v719_v14 }
  0x36   : > { %393 = vmatmul.mubr.bf16.vlgmr.msra.gmra.mrb[0].mxu0 %v720_v15  ;;  %425 = vmatmul.mubr.bf16.vlgmr.msra.gmra.mrb[0].mxu1 %v723_v16 }
  0x37   : > { %633 = vmatprep.mubr.msk.bf16.mxu0 %vm335_vm0, %v726_v17  ;;  %637 = vmatprep.mubr.msk.bf16.mxu1 %vm335_vm0, %v728_v18 }
  0x3e   : > { %401 = vmatmul.mubr.bf16.gmra.mrb[4].mxu0 %v730_v19  ;;  %433 = vmatmul.mubr.bf16.gmra.mrb[4].mxu1 %v731_v20 }
  0x3f   : > { %634 = vmatprep.mubr.msk.bf16.mxu0 %vm335_vm0, %v732_v21  ;;  %638 = vmatprep.mubr.msk.bf16.mxu1 %vm335_vm0, %v734_v22 }
  0x46   : > { %409 = vmatmul.mubr.bf16.gmra.mrb[8].mxu0 %v736_v23  ;;  %441 = vmatmul.mubr.bf16.gmra.mrb[8].mxu1 %v737_v24 }
  0x47   : > { %635 = vmatprep.mubr.msk.bf16.mxu0 %vm335_vm0, %v738_v25  ;;  %639 = vmatprep.mubr.msk.bf16.mxu1 %vm335_vm0, %v740_v26 }
  0x4e   : > { %417 = vmatmul.mubr.bf16.gmra.mrb[12].mxu0 %v742_v27  ;;  %449 = vmatmul.mubr.bf16.gmra.mrb[12].mxu1 %v743_v28 }
 0x109   : > { %v394_v29 = vpop.f32.mrb[0].mxu0  ;;  %v426_v30 = vpop.f32.mrb[0].mxu1 }
 0x10a   : > { %v659_v31 = vpack.c.bf16 %v394_v29, %v394_v29  ;;  %v667_v32 = vpack.c.bf16 %v426_v30, %v426_v30  ;;  %v396_v33 = vpop.f32.mrb[1].mxu0  ;;  %v428_v34 = vpop.f32.mrb[1].mxu1 }
 0x10b   : > { %v397_v35 = vpop.f32.mrb[2].mxu0  ;;  %v429_v36 = vpop.f32.mrb[2].mxu1 }
 0x10c   : > { %522 = vst.msk [vmem:[%s872_s17] sm:$0xf] %vm521_vm1, %v659_v31  ;;  %530 = vst.msk [vmem:[%s872_s17 + $0x20] sm:$0xf] %vm521_vm1, %v667_v32  ;;  %v660_v37 = vpack.c.bf16 %v397_v35, %v397_v35  ;;  %v668_v38 = vpack.c.bf16 %v429_v36, %v429_v36  ;;  %v399_v39 = vpop.f32.mrb[3].mxu0  ;;  %v431_v40 = vpop.f32.mrb[3].mxu1 }
 0x10e   : > { %523 = vst.msk [vmem:[%s872_s17 + $0x4] sm:$0xf] %vm521_vm1, %v660_v37  ;;  %531 = vst.msk [vmem:[%s872_s17 + $0x24] sm:$0xf] %vm521_vm1, %v668_v38 }
 0x111   : > { %v402_v41 = vpop.f32.mrb[4].mxu0  ;;  %v434_v42 = vpop.f32.mrb[4].mxu1 }
 0x112   : > { %v661_v43 = vpack.c.bf16 %v402_v41, %v402_v41  ;;  %v669_v44 = vpack.c.bf16 %v434_v42, %v434_v42  ;;  %v404_v45 = vpop.f32.mrb[5].mxu0  ;;  %v436_v46 = vpop.f32.mrb[5].mxu1 }
 0x113   : > { %v405_v47 = vpop.f32.mrb[6].mxu0  ;;  %v437_v48 = vpop.f32.mrb[6].mxu1 }
 0x114   : > { %524 = vst.msk [vmem:[%s872_s17 + $0x8] sm:$0xf] %vm521_vm1, %v661_v43  ;;  %532 = vst.msk [vmem:[%s872_s17 + $0x28] sm:$0xf] %vm521_vm1, %v669_v44  ;;  %v662_v49 = vpack.c.bf16 %v405_v47, %v405_v47  ;;  %v670_v50 = vpack.c.bf16 %v437_v48, %v437_v48  ;;  %v407_v51 = vpop.f32.mrb[7].mxu0  ;;  %v439_v52 = vpop.f32.mrb[7].mxu1 }
 0x116   : > { %525 = vst.msk [vmem:[%s872_s17 + $0xc] sm:$0xf] %vm521_vm1, %v662_v49  ;;  %533 = vst.msk [vmem:[%s872_s17 + $0x2c] sm:$0xf] %vm521_vm1, %v670_v50 }
 0x119   : > { %v410_v53 = vpop.f32.mrb[8].mxu0  ;;  %v442_v54 = vpop.f32.mrb[8].mxu1 }
 0x11a   : > { %v663_v55 = vpack.c.bf16 %v410_v53, %v410_v53  ;;  %v671_v56 = vpack.c.bf16 %v442_v54, %v442_v54  ;;  %v412_v57 = vpop.f32.mrb[9].mxu0  ;;  %v444_v58 = vpop.f32.mrb[9].mxu1 }
 0x11b   : > { %v413_v59 = vpop.f32.mrb[10].mxu0  ;;  %v445_v60 = vpop.f32.mrb[10].mxu1 }
 0x11c   : > { %526 = vst.msk [vmem:[%s872_s17 + $0x10] sm:$0xf] %vm521_vm1, %v663_v55  ;;  %534 = vst.msk [vmem:[%s872_s17 + $0x30] sm:$0xf] %vm521_vm1, %v671_v56  ;;  %v664_v61 = vpack.c.bf16 %v413_v59, %v413_v59  ;;  %v672_v62 = vpack.c.bf16 %v445_v60, %v445_v60  ;;  %v415_v63 = vpop.f32.mrb[11].mxu0  ;;  %v447_v0 = vpop.f32.mrb[11].mxu1 }
 0x11e   : > { %527 = vst.msk [vmem:[%s872_s17 + $0x14] sm:$0xf] %vm521_vm1, %v664_v61  ;;  %535 = vst.msk [vmem:[%s872_s17 + $0x34] sm:$0xf] %vm521_vm1, %v672_v62 }
 0x121   : > { %v418_v1 = vpop.f32.mrb[12].mxu0  ;;  %v450_v2 = vpop.f32.mrb[12].mxu1 }
 0x122   : > { %v665_v3 = vpack.c.bf16 %v418_v1, %v418_v1  ;;  %v673_v4 = vpack.c.bf16 %v450_v2, %v450_v2  ;;  %v420_v5 = vpop.f32.mrb[13].mxu0  ;;  %v452_v6 = vpop.f32.mrb[13].mxu1 }
 0x123   : > { %v421_v7 = vpop.f32.mrb[14].mxu0  ;;  %v453_v8 = vpop.f32.mrb[14].mxu1 }
 0x124   : > { %528 = vst.msk [vmem:[%s872_s17 + $0x18] sm:$0xf] %vm521_vm1, %v665_v3  ;;  %536 = vst.msk [vmem:[%s872_s17 + $0x38] sm:$0xf] %vm521_vm1, %v673_v4  ;;  %v666_v9 = vpack.c.bf16 %v421_v7, %v421_v7  ;;  %v674_v10 = vpack.c.bf16 %v453_v8, %v453_v8  ;;  %v423_v11 = vpop.f32.mrb[15].mxu0  ;;  %v455_v12 = vpop.f32.mrb[15].mxu1 }
 0x126   : > { %529 = vst.msk [vmem:[%s872_s17 + $0x1c] sm:$0xf] %vm521_vm1, %v666_v9  ;;  %537 = vst.msk [vmem:[%s872_s17 + $0x3c] sm:$0xf] %vm521_vm1, %v674_v10 }
 0x127 PF: > { %s12_s9 = sadd.s32 1, %s750_s9  }
 0x128   : > { %p9_p4 = scmp.ge.s32.totalorder %s12_s9, 4  }
 0x12a   :  { %11 = sbr.rel (!%p9_p4) target bundleno = 1 (0x1), region = 58 }

</bundles_post_ra>
